<compile_context>
chip_gen: v5e
topology: v5e:2x2
jax: 0.10.0
libtpu: 0.0.40
codegen_flags: <defaults>
</compile_context>

<pallas_src>
import math

import jax
import jax.numpy as jnp
from jax import lax
from jax.experimental import pallas as pl
from jax.experimental.pallas import tpu as pltpu


def _make_attn_kernel(scale: float, inv_keep: float, with_mask: bool):
    """Builds the flash-style attention kernel body."""

    def kernel(*refs):
        if with_mask:
            q_ref, k_ref, v_ref, mask_ref, o_ref, m_sc, l_sc, acc_sc = refs
        else:
            q_ref, k_ref, v_ref, o_ref, m_sc, l_sc, acc_sc = refs
            mask_ref = None

        ki = pl.program_id(2)

        @pl.when(ki == 0)
        def _init():
            m_sc[...] = jnp.full(m_sc.shape, -jnp.inf, dtype=m_sc.dtype)
            l_sc[...] = jnp.zeros(l_sc.shape, dtype=l_sc.dtype)
            acc_sc[...] = jnp.zeros(acc_sc.shape, dtype=acc_sc.dtype)

        # (tq, d) and (tk, d) tiles; contract over the feature dim on the MXU.
        q = q_ref[...].astype(jnp.float32) * scale
        k = k_ref[...].astype(jnp.float32)
        s = lax.dot_general(q, k, (((1,), (1,)), ((), ())),
                            preferred_element_type=jnp.float32)  # (tq, tk)

        m_prev = m_sc[...]
        m_new = jnp.maximum(m_prev, s.max(axis=-1, keepdims=True))
        alpha = jnp.exp(m_prev - m_new)
        p = jnp.exp(s - m_new)  # unnormalized attention weights

        # Softmax denominator always uses the UNMASKED weights: dropout in the
        # reference module is applied to the already-normalized weights.
        l_sc[...] = alpha * l_sc[...] + p.sum(axis=-1, keepdims=True)

        if with_mask:
            p_v = p * mask_ref[...].astype(jnp.float32)
        else:
            p_v = p

        acc_sc[...] = alpha * acc_sc[...] + jnp.dot(
            p_v.astype(v_ref.dtype), v_ref[...],
            preferred_element_type=jnp.float32)
        m_sc[...] = m_new

        @pl.when(ki == pl.num_programs(2) - 1)
        def _finalize():
            inv_l = inv_keep / l_sc[...]          # (tq, 1), negligible cost
            o_ref[...] = (acc_sc[...] * inv_l).astype(o_ref.dtype)

    return kernel


def _pick_tile(n: int, candidates) -> int:
    for c in candidates:
        if n >= c and n % c == 0:
            return c
    return n  # fall back to the whole axis (always legal: equals full dim)


def dot_product_attention(queries, keys, values, *, dropout: float = 0.0,
                          training: bool = False, key=None):
    """queries: (B, Nq, d); keys: (B, Nk, d); values: (B, Nk, dv).

    Returns (B, Nq, dv) = dropout(softmax(Q K^T / sqrt(d))) @ V.
    """
    B, Nq, d = queries.shape
    Bk, Nk, dk = keys.shape
    Bv, Nv, dv = values.shape
    assert B == Bk == Bv and dk == d and Nv == Nk

    scale = 1.0 / math.sqrt(d)
    use_dropout = bool(training) and float(dropout) > 0.0
    inv_keep = 1.0 / (1.0 - float(dropout)) if use_dropout else 1.0

    # q tiles: multiples of 8 (sublane); kv tiles: multiples of 128 (lane width
    # of the scores / dropout-mask tiles).  Otherwise take the full axis.
    tq = _pick_tile(Nq, (256, 128, 64, 32, 16, 8))
    tk = _pick_tile(Nk, (512, 256, 128))
    grid = (B, Nq // tq, Nk // tk)

    kernel = _make_attn_kernel(scale, inv_keep, use_dropout)

    in_specs = [
        pl.BlockSpec((None, tq, d), lambda b, qi, ki: (b, qi, 0)),
        pl.BlockSpec((None, tk, d), lambda b, qi, ki: (b, ki, 0)),
        pl.BlockSpec((None, tk, dv), lambda b, qi, ki: (b, ki, 0)),
    ]
    args = [queries, keys, values]

    if use_dropout:
        if key is None:
            key = jax.random.PRNGKey(0)
        # Keep-mask generated in plain JAX (glue); deterministic given `key`.
        keep = jax.random.bernoulli(key, 1.0 - float(dropout), (B, Nq, Nk))
        keep = keep.astype(queries.dtype)
        in_specs.append(pl.BlockSpec((None, tq, tk), lambda b, qi, ki: (b, qi, ki)))
        args.append(keep)

    # TODO(synk): the module attribute `self.attention_weights` (full softmax
    # matrix) is not materialized; only the attention output is returned.

    return pl.pallas_call(
        kernel,
        out_shape=jax.ShapeDtypeStruct((B, Nq, dv), queries.dtype),
        grid_spec=pltpu.PrefetchScalarGridSpec(
            num_scalar_prefetch=0,
            grid=grid,
            in_specs=in_specs,
            out_specs=pl.BlockSpec((None, tq, dv), lambda b, qi, ki: (b, qi, 0)),
            scratch_shapes=[
                pltpu.VMEM((tq, 1), jnp.float32),   # running max
                pltpu.VMEM((tq, 1), jnp.float32),   # running denominator
                pltpu.VMEM((tq, dv), jnp.float32),  # output accumulator
            ],
        ),
        compiler_params=pltpu.CompilerParams(
            dimension_semantics=("parallel", "parallel", "arbitrary")),
    )(*args)


if __name__ == "__main__":
    B, Nq, Nk, d, dv = 2, 8, 8, 32, 32

    root = jax.random.PRNGKey(0)
    kq, kk, kv = jax.random.split(root, 3)
    q = jax.random.normal(kq, (B, Nq, d), dtype=jnp.float32)
    k = jax.random.normal(kk, (B, Nk, d), dtype=jnp.float32)
    v = jax.random.normal(kv, (B, Nk, dv), dtype=jnp.float32)

    # --- eval mode (dropout is identity), matches torch module.eval() ---
    out = dot_product_attention(q, k, v, dropout=0.1, training=False)
    out = jax.block_until_ready(out)

    scores = jnp.einsum("bqd,bkd->bqk", q, k) / math.sqrt(d)
    w = jax.nn.softmax(scores, axis=-1)
    ref = jnp.einsum("bqk,bkv->bqv", w, v)
    assert jnp.allclose(out, ref, atol=1e-5, rtol=1e-5), "eval-mode mismatch"

    # --- training mode: mask is derived from `dkey`, so the reference can
    #     reproduce it exactly ---
    p_drop = 0.1
    dkey = jax.random.PRNGKey(42)
    out_tr = dot_product_attention(q, k, v, dropout=p_drop, training=True, key=dkey)
    out_tr = jax.block_until_ready(out_tr)

    keep = jax.random.bernoulli(dkey, 1.0 - p_drop, (B, Nq, Nk)).astype(jnp.float32)
    ref_tr = jnp.einsum("bqk,bkv->bqv", w * keep / (1.0 - p_drop), v)
    assert jnp.allclose(out_tr, ref_tr, atol=1e-5, rtol=1e-5), "train-mode mismatch"

    print("KERNEL_OK")
</pallas_src>

<mosaic_0001>
module attributes {stable_mosaic.version = 11 : i64} {
  func.func @kernel(%arg0: i32, %arg1: i32, %arg2: i32, %arg3: memref<1x8x32xf32, #tpu.memory_space<vmem>>, %arg4: memref<1x8x32xf32, #tpu.memory_space<vmem>>, %arg5: memref<1x8x32xf32, #tpu.memory_space<vmem>>, %arg6: memref<1x8x32xf32, #tpu.memory_space<vmem>>, %arg7: memref<8x1xf32, #tpu.memory_space<vmem>>, %arg8: memref<8x1xf32, #tpu.memory_space<vmem>>, %arg9: memref<8x32xf32, #tpu.memory_space<vmem>>) attributes {dimension_semantics = [#tpu.dimension_semantics<parallel>, #tpu.dimension_semantics<parallel>, #tpu.dimension_semantics<arbitrary>], iteration_bounds = array<i64: 2, 1, 1>, scalar_prefetch = 0 : i64, scratch_operands = 3 : i64, tpu.core_type = #tpu.core_type<tc>, window_params = [{transform_indices = @transform_0, window_bounds = array<i64: 1, 8, 32>}, {transform_indices = @transform_1, window_bounds = array<i64: 1, 8, 32>}, {transform_indices = @transform_2, window_bounds = array<i64: 1, 8, 32>}, {transform_indices = @transform_3, window_bounds = array<i64: 1, 8, 32>}]} {
    %c0_i32 = arith.constant 0 : i32
    %0 = arith.cmpi eq, %arg2, %c0_i32 : i32
    %1 = arith.extui %0 : i1 to i32
    %c0_i32_0 = arith.constant 0 : i32
    %2 = arith.cmpi ne, %1, %c0_i32_0 : i32
    scf.if %2 {
      %cst_27 = arith.constant 0xFF800000 : f32
      %37 = vector.broadcast %cst_27 : f32 to vector<8x1xf32>
      %c0_28 = arith.constant 0 : index
      %c0_29 = arith.constant 0 : index
      %38 = vector.load %arg7[%c0_28, %c0_29] : memref<8x1xf32, #tpu.memory_space<vmem>>, vector<8x1xf32>
      tpu.vector_store %arg7[%c0_28, %c0_29], %37 {strides = array<i32>} : memref<8x1xf32, #tpu.memory_space<vmem>>, vector<8x1xf32>,
      %cst_30 = arith.constant 0.000000e+00 : f32
      %39 = vector.broadcast %cst_30 : f32 to vector<8x1xf32>
      %c0_31 = arith.constant 0 : index
      %c0_32 = arith.constant 0 : index
      %40 = vector.load %arg8[%c0_31, %c0_32] : memref<8x1xf32, #tpu.memory_space<vmem>>, vector<8x1xf32>
      tpu.vector_store %arg8[%c0_31, %c0_32], %39 {strides = array<i32>} : memref<8x1xf32, #tpu.memory_space<vmem>>, vector<8x1xf32>,
      %cst_33 = arith.constant 0.000000e+00 : f32
      %41 = vector.broadcast %cst_33 : f32 to vector<8x32xf32>
      %c0_34 = arith.constant 0 : index
      %c0_35 = arith.constant 0 : index
      %42 = vector.load %arg9[%c0_34, %c0_35] : memref<8x32xf32, #tpu.memory_space<vmem>>, vector<8x32xf32>
      tpu.vector_store %arg9[%c0_34, %c0_35], %41 {strides = array<i32>} : memref<8x32xf32, #tpu.memory_space<vmem>>, vector<8x32xf32>,
    } else {
    }
    %c0 = arith.constant 0 : index
    %c0_1 = arith.constant 0 : index
    %c0_2 = arith.constant 0 : index
    %3 = vector.load %arg3[%c0, %c0_1, %c0_2] : memref<1x8x32xf32, #tpu.memory_space<vmem>>, vector<1x8x32xf32>
    %4 = vector.shape_cast %3 : vector<1x8x32xf32> to vector<8x32xf32>
    %cst = arith.constant 0.176776692 : f32
    %5 = vector.broadcast %cst : f32 to vector<8x32xf32>
    %6 = arith.mulf %4, %5 : vector<8x32xf32>
    %c0_3 = arith.constant 0 : index
    %c0_4 = arith.constant 0 : index
    %c0_5 = arith.constant 0 : index
    %7 = vector.load %arg4[%c0_3, %c0_4, %c0_5] : memref<1x8x32xf32, #tpu.memory_space<vmem>>, vector<1x8x32xf32>
    %8 = vector.shape_cast %7 : vector<1x8x32xf32> to vector<8x32xf32>
    %cst_6 = arith.constant dense<0.000000e+00> : vector<8x8xf32>
    %9 = tpu.matmul %6, %8, %cst_6 {dimension_numbers = #tpu.dot_dimension_numbers<[1], [1], [0], [0], [0, 0, 1, 0], [], []>} : vector<8x32xf32>, vector<8x32xf32>, vector<8x8xf32> -> vector<8x8xf32>
    %c0_7 = arith.constant 0 : index
    %c0_8 = arith.constant 0 : index
    %10 = vector.load %arg7[%c0_7, %c0_8] : memref<8x1xf32, #tpu.memory_space<vmem>>, vector<8x1xf32>
    %cst_9 = arith.constant dense<0xFF800000> : vector<8xf32>
    %11 = vector.multi_reduction <maximumf>, %9, %cst_9 [1] : vector<8x8xf32> to vector<8xf32>
    %12 = vector.shape_cast %11 : vector<8xf32> to vector<8x1xf32>
    %13 = arith.maximumf %10, %12 : vector<8x1xf32>
    %14 = arith.subf %10, %13 : vector<8x1xf32>
    %15 = math.exp %14 : vector<8x1xf32>
    %16 = vector.broadcast %13 : vector<8x1xf32> to vector<8x8xf32>
    %17 = arith.subf %9, %16 : vector<8x8xf32>
    %18 = math.exp %17 : vector<8x8xf32>
    %c0_10 = arith.constant 0 : index
    %c0_11 = arith.constant 0 : index
    %19 = vector.load %arg8[%c0_10, %c0_11] : memref<8x1xf32, #tpu.memory_space<vmem>>, vector<8x1xf32>
    %20 = arith.mulf %15, %19 : vector<8x1xf32>
    %cst_12 = arith.constant dense<0.000000e+00> : vector<8xf32>
    %21 = vector.multi_reduction <add>, %18, %cst_12 [1] : vector<8x8xf32> to vector<8xf32>
    %22 = vector.shape_cast %21 : vector<8xf32> to vector<8x1xf32>
    %23 = arith.addf %20, %22 : vector<8x1xf32>
    %c0_13 = arith.constant 0 : index
    %c0_14 = arith.constant 0 : index
    %24 = vector.load %arg8[%c0_13, %c0_14] : memref<8x1xf32, #tpu.memory_space<vmem>>, vector<8x1xf32>
    tpu.vector_store %arg8[%c0_13, %c0_14], %23 {strides = array<i32>} : memref<8x1xf32, #tpu.memory_space<vmem>>, vector<8x1xf32>,
    %c0_15 = arith.constant 0 : index
    %c0_16 = arith.constant 0 : index
    %25 = vector.load %arg9[%c0_15, %c0_16] : memref<8x32xf32, #tpu.memory_space<vmem>>, vector<8x32xf32>
    %26 = vector.broadcast %15 : vector<8x1xf32> to vector<8x32xf32>
    %27 = arith.mulf %26, %25 : vector<8x32xf32>
    %c0_17 = arith.constant 0 : index
    %c0_18 = arith.constant 0 : index
    %c0_19 = arith.constant 0 : index
    %28 = vector.load %arg5[%c0_17, %c0_18, %c0_19] : memref<1x8x32xf32, #tpu.memory_space<vmem>>, vector<1x8x32xf32>
    %29 = vector.shape_cast %28 : vector<1x8x32xf32> to vector<8x32xf32>
    %cst_20 = arith.constant dense<0.000000e+00> : vector<8x32xf32>
    %30 = tpu.matmul %18, %29, %cst_20 {dimension_numbers = #tpu.dot_dimension_numbers<[1], [0], [0], [1], [0, 0, 1, 1], [], []>} : vector<8x8xf32>, vector<8x32xf32>, vector<8x32xf32> -> vector<8x32xf32>
    %31 = arith.addf %27, %30 : vector<8x32xf32>
    %c0_21 = arith.constant 0 : index
    %c0_22 = arith.constant 0 : index
    %32 = vector.load %arg9[%c0_21, %c0_22] : memref<8x32xf32, #tpu.memory_space<vmem>>, vector<8x32xf32>
    tpu.vector_store %arg9[%c0_21, %c0_22], %31 {strides = array<i32>} : memref<8x32xf32, #tpu.memory_space<vmem>>, vector<8x32xf32>,
    %c0_23 = arith.constant 0 : index
    %c0_24 = arith.constant 0 : index
    %33 = vector.load %arg7[%c0_23, %c0_24] : memref<8x1xf32, #tpu.memory_space<vmem>>, vector<8x1xf32>
    tpu.vector_store %arg7[%c0_23, %c0_24], %13 {strides = array<i32>} : memref<8x1xf32, #tpu.memory_space<vmem>>, vector<8x1xf32>,
    %c0_i32_25 = arith.constant 0 : i32
    %34 = arith.cmpi eq, %arg2, %c0_i32_25 : i32
    %35 = arith.extui %34 : i1 to i32
    %c0_i32_26 = arith.constant 0 : i32
    %36 = arith.cmpi ne, %35, %c0_i32_26 : i32
    scf.if %36 {
      %c0_27 = arith.constant 0 : index
      %c0_28 = arith.constant 0 : index
      %37 = vector.load %arg8[%c0_27, %c0_28] : memref<8x1xf32, #tpu.memory_space<vmem>>, vector<8x1xf32>
      %cst_29 = arith.constant 1.000000e+00 : f32
      %38 = vector.broadcast %cst_29 : f32 to vector<8x1xf32>
      %39 = arith.divf %38, %37 : vector<8x1xf32>
      %c0_30 = arith.constant 0 : index
      %c0_31 = arith.constant 0 : index
      %40 = vector.load %arg9[%c0_30, %c0_31] : memref<8x32xf32, #tpu.memory_space<vmem>>, vector<8x32xf32>
      %41 = vector.broadcast %39 : vector<8x1xf32> to vector<8x32xf32>
      %42 = arith.mulf %40, %41 : vector<8x32xf32>
      %c0_32 = arith.constant 0 : index
      %c0_33 = arith.constant 0 : index
      %c0_34 = arith.constant 0 : index
      %43 = vector.load %arg6[%c0_32, %c0_33, %c0_34] : memref<1x8x32xf32, #tpu.memory_space<vmem>>, vector<1x8x32xf32>
      %44 = vector.shape_cast %43 : vector<1x8x32xf32> to vector<8x32xf32>
      %45 = vector.shape_cast %42 : vector<8x32xf32> to vector<1x8x32xf32>
      tpu.vector_store %arg6[%c0_32, %c0_33, %c0_34], %45 {strides = array<i32>} : memref<1x8x32xf32, #tpu.memory_space<vmem>>, vector<1x8x32xf32>,
    } else {
    }
    return
  }
  func.func @transform_0(%arg0: i32, %arg1: i32, %arg2: i32) -> (i32, i32, i32) {
    %c0_i32 = arith.constant 0 : i32
    %c0_i32_0 = arith.constant 0 : i32
    return %arg0, %arg1, %c0_i32 : i32, i32, i32
  }
  func.func @transform_1(%arg0: i32, %arg1: i32, %arg2: i32) -> (i32, i32, i32) {
    %c0_i32 = arith.constant 0 : i32
    %c0_i32_0 = arith.constant 0 : i32
    return %arg0, %arg2, %c0_i32 : i32, i32, i32
  }
  func.func @transform_2(%arg0: i32, %arg1: i32, %arg2: i32) -> (i32, i32, i32) {
    %c0_i32 = arith.constant 0 : i32
    %c0_i32_0 = arith.constant 0 : i32
    return %arg0, %arg2, %c0_i32 : i32, i32, i32
  }
  func.func @transform_3(%arg0: i32, %arg1: i32, %arg2: i32) -> (i32, i32, i32) {
    %c0_i32 = arith.constant 0 : i32
    %c0_i32_0 = arith.constant 0 : i32
    return %arg0, %arg1, %c0_i32 : i32, i32, i32
  }
}

</mosaic_0001>

<bundles_post_ra>
// kernel: tpu_custom_call.1
= control target key start
LH: loop header
LB: loop body
LE: loop exit
PB: predicated region body
PF: predicated region fallthrough
CT: control target
= control target key end

     0   :  { %s1040_s0 = inlined_call_operand.hbm [shape: f32[2,8,32], index: 0, kind: input, shape index: {}]   ;;  %s1041_s1 = inlined_call_operand.hbm [shape: f32[2,8,32], index: 1, kind: input, shape index: {}]   ;;  %s1042_s2 = inlined_call_operand.hbm [shape: f32[2,8,32], index: 2, kind: input, shape index: {}]   ;;  %s1043_s3 = inlined_call_operand.hbm [shape: f32[2,8,32], index: 3, kind: output, shape index: {}]  }
   0x1   :  { %1046 = sst [smem:[#allocation18_spill]] %s1041_s1 }
   0x2   :  { %8 = vsyncpa [#allocation6], 0 }
   0x3   :  { %10 = vsyncpa [#allocation6 + $0x1], 0 }
   0x4   :  { %11 = vsyncpa [#allocation9], 0 }
   0x5   :  { %13 = vsyncpa [#allocation9 + $0x1], 0 }
   0x6   :  { %14 = vsyncpa [#allocation7], 0 }
   0x7   :  { %16 = vsyncpa [#allocation7 + $0x1], 0  ;;  %s870_s12 = smov 0   ;;  %s872_s13 = smov 0  }
   0x8   :  { %s874_s14 = smov 0   ;;  %s876_s15 = smov 0  }
   0x9   :  { %s878_s16 = smov 0   ;;  %s880_s17 = smov 0  }
   0xa LB: > { %1047 = sst [smem:[#allocation15_spill]] %s841_s16  ;;  %s901_s18 = sadd.s32 4294967295, %s845_s17   ;;  %s845_s17 = sphi %s880_s17, %s22_s17   ;;  %s841_s16 = sphi %s878_s16, %s1059_s16   ;;  %s837_s15 = sphi %s876_s15, %s1058_s15   ;;  %s833_s14 = sphi %s874_s14, %s1062_s14   ;;  %s829_s13 = sphi %s872_s13, %s1061_s13   ;;  %s825_s12 = sphi %s870_s12, %s1060_s12  }
   0xb   : > { %s564_s19 = sadd.s32 4294967294, %s845_s17   ;;  %s41_s20 = sadd.s32 1, %s841_s16 }
   0xc   : > { %s50_s21 = sadd.s32 1, %s833_s14  ;;  %p43_p0 = scmp.ge.s32.totalorder %s41_s20, 2 }
   0xd   : > { %p57_p1 = scmp.ne.s32.totalorder %s833_s14, %s829_s13  ;;  %p58_p2 = scmp.eq.s32.totalorder %s845_s17, 0 }
   0xe   : > { %p63_p3 = scmp.ne.s32.totalorder %s829_s13, %s825_s12  ;;  %s1064_s20 = smov (%p43_p0, %s41_s20), 0 }
   0xf   : > { %1048 = sst [smem:[#allocation16_spill]] %s1064_s20  ;;  %p913_p4 = por %p58_p2, %p57_p1 }
  0x10   : > { %p64_p5 = scmp.eq.s32.totalorder %s901_s18, 0  ;;  %s45_s23 = ssub.s32 %s841_s16, %s1064_s20 }
  0x11   : > { %p145_p6 = scmp.eq.s32.totalorder %s901_s18, 1  ;;  %p48_p7 = scmp.eq.s32.totalorder %s45_s23, 0 }
  0x12   : > { %p921_p8 = por %p64_p5, %p63_p3  ;;  %p151_p10 = scmp.eq.s32.totalorder %s564_s19, 1 }
  0x13   : > { %p925_p9 = por %p145_p6, %p57_p1  ;;  %p566_p12 = scmp.ge.s32.totalorder %s845_s17, 2 }
  0x14   : > { %s930_s26 = scalar_select %p48_p7, %s833_s14, %s50_s21  }
  0x15   : > { %p932_p11 = por %p151_p10, %p63_p3  ;;  %p607_p13 = scmp.lt.s32.totalorder %s845_s17, 2 }
  0x16   : > { %1052 = sst [smem:[#allocation17_spill]] %s930_s26  ;;  %s171_s28 = sand.u32 1, %s833_s14  }
  0x17   : > { %s567_s29 = sshll.u32 %s171_s28, 3  ;;  %s568_s30 = sshll.u32 %s841_s16, 3 }
  0x18   : > { %p942_p0 = pnand %p607_p13, %p913_p4  ;;  %s191_s5 = sand.u32 1, %s845_s17  }
  0x19   : > { %s1055_s1 = sld [smem:[#allocation18_spill]]  ;;  %s195_s10 = scalar_lea.vmem [#allocation8], %s567_s29 }
  0x1a   : > { %s204_s11 = sshll.u32 %s195_s10, 4  ;;  %s192_s19 = scalar_lea.sflag [#allocation9], %s191_s5  ;;  %s205_s11 = int_to_ptr.vmem [resolvable:$true] %s204_s11 }
  0x1b   : > { %p573_p1 = scmp.ge.s32.totalorder %s845_s17, 1  ;;  %p229_p2 = scmp.lt.s32.totalorder %s845_s17, 3 }
  0x1c   : > { %s180_s6 = scalar_lea.hbm %s1040_s0, %s568_s30  ;;  %s172_s10 = scalar_lea.sflag [#allocation6], %s171_s28 }
  0x1d   : > { %p954_p3 = pnand %p573_p1, %p229_p2  ;;  %s182_s7 = sshll.u32 %s180_s6, 4  ;;  %s183_s7 = int_to_ptr.hbm [resolvable:$true] %s182_s7 }
  0x1e   : > { %s215_s16 = scalar_lea.vmem [#allocation10], %s567_s29  ;;  %s971_s22 = sand.u32 (!%p954_p3), 1, %s829_s13  }
  0x1f   : > { %s200_s8 = scalar_lea.hbm %s1055_s1, %s568_s30  ;;  %s224_s26 = sshll.u32 %s215_s16, 4  ;;  %s225_s26 = int_to_ptr.vmem [resolvable:$true] %s224_s26 }
  0x20   : > { %s202_s9 = sshll.u32 %s200_s8, 4  ;;  %s175_s8 = scalar_lea.vmem [#allocation5], %s567_s29  ;;  %s203_s9 = int_to_ptr.hbm [resolvable:$true] %s202_s9 }
  0x21   : > { %599 = dma.hbm_to_vmem [thread:$0]  (!%p942_p0), %s203_s9, 128, %s205_s11, %s192_s19  }
  0x22   : > { %s184_s1 = sshll.u32 %s175_s8, 4  ;;  %s220_s11 = scalar_lea.hbm %s1042_s2, %s568_s30  ;;  %s185_s1 = int_to_ptr.vmem [resolvable:$true] %s184_s1 }
  0x23   : > { %596 = dma.hbm_to_vmem [thread:$0]  (!%p942_p0), %s183_s7, 128, %s185_s1, %s172_s10  }
  0x24   : > { %s222_s20 = sshll.u32 %s220_s11, 4  ;;  %233 = sbr.rel (%p954_p3) target bundleno = 660 (0x294), region = 32  ;;  %s223_s20 = int_to_ptr.hbm [resolvable:$true] %s222_s20 }
  0x25   : > { %602 = dma.hbm_to_vmem [thread:$0]  (!%p942_p0), %s223_s20, 128, %s225_s26, %s192_s19  }
  0x26   : > { %s974_s1 = sshll.u32 (!%p954_p3), %s971_s22, 3  ;;  %s236_s28 = scalar_lea.sflag (!%p954_p3), [#allocation6], %s971_s22 }
  0x27   : > { %s239_s30 = scalar_lea.vmem (!%p954_p3), [#allocation5], %s974_s1 }
  0x29   : > { %812 = dma.done.wait (%p921_p8), %s236_s28, 128  }
  0x2a   : > { %814 = vsyncadd (%p921_p8), %s236_s28, 4294967168  ;;  %s245_s16 = sand.u32 1, %s901_s18   ;;  %s249_s26 = scalar_lea.vmem [#allocation8], %s974_s1 }
  0x2b   : > { %s246_s20 = scalar_lea.sflag [#allocation9], %s245_s16 }
  0x2c   : > { %816 = dma.done.wait (%p921_p8), %s246_s20, 256  }
  0x2d   : > { %818 = vsyncadd (%p921_p8), %s246_s20, 4294967040  ;;  %vm300_vm0 = vcmask 261120   ;;  %v847_v0 = vmov 0.0   ;;  %v304_v1 = vld [vmem:[%s249_s26] sm:$0xff]  ;;  %v302_v2 = vld [vmem:[%s239_s30] sm:$0xff]  ;;  %vm297_vm1 = vcmask 7168  }
  0x2e   : > { %301 = vst.msk [vmem:[#allocation4] sm:$0xff] %vm300_vm0, %v847_v0  ;;  %578 = vmatpush.xpose.msk.msra.mxu0 %vm300_vm0, %v304_v1  ;;  %v303_v3 = vmul.f32 0.17677669, %v302_v2  ;;  %v848_v4 = vmov -inf   ;;  %vm333_vm2 = vcmask 64512   ;;  %v849_v7 = vmov 0  }
  0x2f   : > { %298 = vst.msk [vmem:[#allocation2] sm:$0xff] %vm297_vm1, %v848_v4  ;;  %660 = vset.pattern.permute.xlu0 %v849_v7  ;;  %661 = vset.pattern.permute.xlu1 %v849_v7  ;;  %s259_s18 = scalar_lea.vmem [#allocation10], %s974_s1  ;;  %s582_s24 = sshll.u32 %s837_s15, 3 }
  0x30   : > { %299 = vst.msk [vmem:[#allocation3] sm:$0xff] %vm297_vm1, %v847_v0  ;;  %662 = vset.pattern.permute.xlu2 %v849_v7  ;;  %v364_v12 = vld [vmem:[%s259_s18] sm:$0xff]  ;;  %s430_s19 = scalar_lea.hbm %s1043_s3, %s582_s24  ;;  %s292_s21 = scalar_lea.vmem [#allocation11], %s974_s1 }
  0x31   : > { %579 = vmatmul.msk.f32.vlgmr.msra.gmra.mxu0 %vm300_vm0, %v303_v3  ;;  %383 = vmatpush.msra.mxu1 %v364_v12  ;;  %s432_s23 = sshll.u32 %s292_s21, 4  ;;  %s434_s6 = sshll.u32 %s430_s19, 4  ;;  %s433_s23 = int_to_ptr.vmem [resolvable:$true] %s432_s23  ;;  %s435_s6 = int_to_ptr.hbm [resolvable:$true] %s434_s6 }
  0x32   : > { %s419_s7 = scalar_lea.sflag [#allocation7], %s971_s22  ;;  %s773_s8 = sshra.s32 %s435_s6, 4  ;;  %s774_s8 = int_to_ptr.hbm [resolvable:$true] %s773_s8 }
  0x33   : > { %s775_s10 = scalar_lea.hbm %s774_s8, 8  ;;  %s779_s9 = scalar_lea.hbm %s1043_s3, 16 }
  0x34   : > { %p776_p4 = scmp.ne.s32.totalorder %s774_s8, %s775_s10  ;;  %p780_p7 = scmp.lt.s32.totalorder %s774_s8, %s1043_s3 }
  0x35   : > { %v357_v29 = vld [vmem:[#allocation4] sm:$0xff]  ;;  %p781_p8 = scmp.lt.s32.totalorder %s779_s9, %s775_s10 }
  0x36   : > { %v332_v8 = vld [vmem:[#allocation2] sm:$0xff]  ;;  %p777_p5 = pnand %p776_p4, %p925_p9 }
  0x37   : > { %v349_v20 = vld [vmem:[#allocation3] sm:$0xff]  ;;  %p782_p10 = por %p781_p8, %p780_p7 }
  0x38   : > { %p778_p6 = pneg %p777_p5 }
  0x3a   : > { %p783_p13 = pnand %p782_p10, %p778_p6 }
  0xae   : > { %v329_v5 = vpop.f32.mrf.mxu0 }
  0xaf   : > { %v334_v6 = vsel %vm333_vm2, %v329_v5, -inf }
  0xb0   : > { %335 = vmax.xlane.f32.xlu0 %v334_v6 }
 0x123   : > { %v336_v9 = vpop.xlane.xlu0 %335 }
 0x124   : > { %v337_v10 = vmax.f32 %v332_v8, %v336_v9 }
 0x126   : > { %v338_v11 = vsub.f32 %v332_v8, %v337_v10  ;;  %390 = vst.msk [vmem:[#allocation2] sm:$0xff] %vm297_vm1, %v337_v10  ;;  %343 = vperm.xlu0 %660, %v337_v10  }
 0x128   : > { %v339_v18 = vmul.f32 1.442695, %v338_v11 }
 0x198   : > { %v344_v13 = vpop.permute.xlu0 %343 }
 0x199   : > { %v346_v14 = vsub.f32 %v329_v5, %v344_v13 }
 0x19b   : > { %v347_v15 = vmul.f32 1.442695, %v346_v14 }
 0x19d   : > { %663 = vpow2.f32 %v347_v15 }
 0x19e   : > { %665 = vpow2.f32 %v339_v18 }
 0x1a3   : > { %v664_v16 = vpop.eup %663 }
 0x1a4   : > { %580 = vmatmul.msk.f32.vlgmr.msra.gmra.mxu1 %vm333_vm2, %v664_v16  ;;  %v351_v17 = vsel %vm333_vm2, %v664_v16, 0.0  ;;  %v666_v19 = vpop.eup %665 }
 0x1a5   : > { %352 = vadd.xlane.f32.xlu1 %v351_v17  ;;  %v350_v21 = vmul.f32 %v666_v19, %v349_v20 }
 0x1be   : > { %360 = vperm.xlu1 %661, %v666_v19  }
 0x218   : > { %v353_v22 = vpop.xlane.xlu1 %352 }
 0x219   : > { %v354_v23 = vadd.f32 %v353_v22, %v350_v21 }
 0x21b   : > { %356 = vst.msk [vmem:[#allocation3] sm:$0xff] %vm297_vm1, %v354_v23 }
 0x221   : > { %v385_v36 = vpop.f32.mrf.mxu1 }
 0x222   : > { %v394_v24 = vld [vmem:[#allocation3] sm:$0xff] }
 0x223   : > { %667 = vrcp.f32 %v394_v24  ;;  %v406_v28 = vand.u32 2147483648, %v394_v24  ;;  %v404_v31 = vand.u32 2147483647, %v394_v24  ;;  %vm400_vm4 = vweird.f32 %v394_v24 }
 0x225   : > { %v407_v35 = vor.u32 1.1754944e-38, %v406_v28  ;;  %vm405_vm6 = vcmp.eq.f32.partialorder %v404_v31, 8.507059e+37 }
 0x229   : > { %v668_v25 = vpop.eup %667 }
 0x22a   : > { %v396_v26 = vmul.f32 %v668_v25, %v394_v24  ;;  %vm401_vm3 = vweird.f32 %v668_v25 }
 0x22b   : > { %vm402_vm5 = vmor %vm400_vm4, %vm401_vm3 }
 0x22c   : > { %v397_v27 = vsub.f32 1.0, %v396_v26 }
 0x22e   : > { %v398_v30 = vmul.f32 %v668_v25, %v397_v27 }
 0x230   : > { %v361_v32 = vpop.permute.xlu1 %360  ;;  %v399_v33 = vadd.f32 %v668_v25, %v398_v30 }
 0x231   : > { %v363_v34 = vmul.f32 %v361_v32, %v357_v29 }
 0x232   : > { %v403_v37 = vsel %vm402_vm5, %v668_v25, %v399_v33 }
 0x233   : > { %v388_v38 = vadd.f32 %v385_v36, %v363_v34  ;;  %v408_v39 = vsel %vm405_vm6, %v407_v35, %v403_v37 }
 0x234   : > { %413 = vperm.xlu2 %662, %v408_v39  }
 0x235   : > { %389 = vst.msk [vmem:[#allocation4] sm:$0xff] %vm300_vm0, %v388_v38 }
 0x23c   : > { %v410_v40 = vld [vmem:[#allocation4] sm:$0xff] }
 0x28e   : > { %v414_v41 = vpop.permute.xlu2 %413 }
 0x28f   : > { %v416_v42 = vmul.f32 %v414_v41, %v410_v40 }
 0x291   : > { %417 = vst.msk [vmem:[%s292_s21] sm:$0xff] %vm300_vm0, %v416_v42 }
 0x292   : > { %786 = shalt.err (!%p783_p13)
}
 0x293   : > { %591 = dma.vmem_to_hbm [thread:$0]  (%p925_p9), %s433_s23, 128, %s435_s6, %s419_s7  }
 0x294 PF: > { %s446_s22 = sand.u32 1, %s825_s12   ;;  %p604_p0 = pnand %p566_p12, %p932_p11 }
 0x295   : > { %s447_s28 = scalar_lea.sflag [#allocation7], %s446_s22 }
 0x296   : > { %p605_p1 = pneg %p604_p0 }
 0x298   : > { %820 = dma.done.wait (%p605_p1), %s447_s28, 128  }
 0x299   : > { %822 = vsyncadd (%p605_p1), %s447_s28, 4294967168  ;;  %s22_s17 = sadd.s32 1, %s845_s17   ;;  %s1057_s30 = sld [smem:[#allocation17_spill]] }
 0x29a   : > { %p19_p2 = scmp.ge.s32.totalorder %s22_s17, 4   ;;  %s1058_s15 = sld [smem:[#allocation15_spill]] }
 0x29b   : > { %s1059_s16 = sld [smem:[#allocation16_spill]]  ;;  %s1060_s12 = smov %s829_s13 }
 0x29c   : > { %s1061_s13 = smov %s833_s14  ;;  %21 = sbr.rel (!%p19_p2) target bundleno = 10 (0xa), region = 109 }
 0x29f   : > { %s1062_s14 = smov %s1057_s30 }
 0x2a1   :  { %453 = vsyncpa [#allocation6], 1 }
 0x2a2   :  { %455 = vsyncpa [#allocation6 + $0x1], 1 }
 0x2a3   :  { %456 = vsyncpa [#allocation9], 1 }
 0x2a4   :  { %458 = vsyncpa [#allocation9 + $0x1], 1 }
 0x2a5   :  { %459 = vsyncpa [#allocation7], 1 }
 0x2a6   :  { %461 = vsyncpa [#allocation7 + $0x1], 1 }

</bundles_post_ra>
